<compile_context>
chip_gen: v7x
topology: tpu7x:2x2x1
jax: 0.10.0
libtpu: 0.0.40
codegen_flags: <defaults>
</compile_context>

<pallas_src>
import functools
import math

import jax
import jax.numpy as jnp
from jax import lax
from jax.experimental import pallas as pl
from jax.experimental.pallas import tpu as pltpu

_LANES = 128
_SUBLANES = 8
_MAX_BLOCK_BYTES = 4 * 1024 * 1024     # 4 MiB per input block (dtype-scaled rows)
_VMEM_LIMIT_BYTES = 32 * 1024 * 1024   # raise v5e's 16 MiB scoped default
# Finite "minus infinity" for the running max so positions that never see a
# valid element cannot produce exp(-inf - (-inf)) = NaN.
_NEG_INIT = float(jnp.finfo(jnp.float32).min)


def _round_up(x: int, m: int) -> int:
    return ((x + m - 1) // m) * m


def _plan_tiling(n: int, itemsize: int, max_block_bytes: int):
    """Balanced, dtype-scaled tiling over a (rows, 128) view of n elements."""
    row_align = max(_SUBLANES, 32 // itemsize)            # f32: 8, bf16: 16, i8: 32
    max_tile_rows = (max_block_bytes // (_LANES * itemsize)) // row_align * row_align
    max_tile_rows = max(row_align, max_tile_rows)
    rows_needed = -(-n // _LANES)
    num_tiles = -(-rows_needed // max_tile_rows)
    num_cores = 2 if num_tiles >= 2 else 1                 # v7x 2-TC split
    tiles_per_core = -(-num_tiles // num_cores)
    total_tiles = num_cores * tiles_per_core
    tile_rows = _round_up(-(-rows_needed // total_tiles), row_align)
    return row_align, tile_rows, num_cores, tiles_per_core, total_tiles


def _dvr_partials_kernel(tj_ref, tm_ref, sum_ref, max_ref, se_ref, *,
                         n, tile_rows, tiles_per_core):
    """One grid step: fold one (tile_rows, 128) tile of each input into the
    per-core (1, 8, 128) running sum / running max / rescaled exp-sum."""
    c = pl.program_id(0)   # core (parallel)
    t = pl.program_id(1)   # tile within core (arbitrary / streaming)

    @pl.when(t == 0)
    def _init():
        sum_ref[...] = jnp.zeros_like(sum_ref)
        max_ref[...] = jnp.full_like(max_ref, _NEG_INIT)
        se_ref[...] = jnp.zeros_like(se_ref)

    # In-kernel cast keeps HBM traffic at native input width (e.g. bf16).
    tj = tj_ref[...].astype(jnp.float32)
    tm = tm_ref[...].astype(jnp.float32)

    # Validity mask against the true element count n (flat, row-major order).
    # Masks both the 128-alignment padding and any unspecified data in ragged /
    # clamped boundary blocks, so no value-specific wrapper padding is needed.
    rid = lax.broadcasted_iota(jnp.int32, (tile_rows, _LANES), 0)
    lid = lax.broadcasted_iota(jnp.int32, (tile_rows, _LANES), 1)
    local_flat = rid * _LANES + lid
    logical_tile = c * tiles_per_core + t
    remaining = n - logical_tile * (tile_rows * _LANES)
    valid = local_flat < remaining
    tj = jnp.where(valid, tj, 0.0)
    tm = jnp.where(valid, tm, -jnp.inf)

    # Per-(sublane, lane) streaming accumulators: only cross-vreg VPU
    # adds / maxes here; the single cross-lane XLU reduction happens once in
    # the wrapper epilogue.
    g = tile_rows // _SUBLANES
    tj3 = tj.reshape(g, _SUBLANES, _LANES)
    tm3 = tm.reshape(g, _SUBLANES, _LANES)

    sum_ref[...] = sum_ref[...] + jnp.sum(tj3, axis=0, keepdims=True)

    m_old = max_ref[...]                                            # (1, 8, 128)
    m_new = jnp.maximum(m_old, jnp.max(tm3, axis=0, keepdims=True))
    se_ref[...] = (se_ref[...] * jnp.exp(m_old - m_new)
                   + jnp.sum(jnp.exp(tm3 - m_new), axis=0, keepdims=True))
    max_ref[...] = m_new


@functools.partial(jax.jit, static_argnames=("max_block_bytes",))
def dvr_loss_pallas(T_joined: jax.Array, T_marginal: jax.Array,
                    max_block_bytes: int = _MAX_BLOCK_BYTES):
    """Returns (loss, logmeanexp(T_marginal)) as f32 scalars."""
    if T_joined.ndim != 1 or T_marginal.ndim != 1:
        raise ValueError("T_joined / T_marginal must be 1-D (one statistic per sample)")
    if T_joined.shape[0] != T_marginal.shape[0]:
        raise ValueError("T_joined and T_marginal must have the same length")
    n = T_joined.shape[0]
    if n < 1:
        raise ValueError("empty batch")

    itemsize = max(T_joined.dtype.itemsize, T_marginal.dtype.itemsize)
    row_align, tile_rows, num_cores, tiles_per_core, total_tiles = _plan_tiling(
        n, itemsize, max_block_bytes)

    if n % (_LANES * row_align) == 0:
        # Zero-copy: contiguous 1-D -> (rows, 128) reshape is a free bitcast.
        rows = n // _LANES
        tj2 = T_joined.reshape(rows, _LANES)
        tm2 = T_marginal.reshape(rows, _LANES)
    else:
        # Minimal pad to a clean multiple of the tiling; pad values are never
        # read thanks to the in-kernel mask.
        rows = total_tiles * tile_rows
        pad = rows * _LANES - n
        tj2 = jnp.pad(T_joined, (0, pad)).reshape(rows, _LANES)
        tm2 = jnp.pad(T_marginal, (0, pad)).reshape(rows, _LANES)

    # Last block index that actually starts inside the array; redundant logical
    # tiles (from the 2-core split) are clamped here and fully masked in-kernel.
    last_block = -(-rows // tile_rows) - 1

    def in_map(c, t):
        return (jnp.minimum(c * tiles_per_core + t, last_block), 0)

    def out_map(c, t):
        return (c, 0, 0)

    kernel = functools.partial(_dvr_partials_kernel, n=n, tile_rows=tile_rows,
                               tiles_per_core=tiles_per_core)

    part_shape = jax.ShapeDtypeStruct((num_cores, _SUBLANES, _LANES), jnp.float32)
    part_sum, part_max, part_se = pl.pallas_call(
        kernel,
        out_shape=(part_shape, part_shape, part_shape),
        grid=(num_cores, tiles_per_core),
        in_specs=[
            pl.BlockSpec((tile_rows, _LANES), in_map),
            pl.BlockSpec((tile_rows, _LANES), in_map),
        ],
        out_specs=(
            pl.BlockSpec((1, _SUBLANES, _LANES), out_map),
            pl.BlockSpec((1, _SUBLANES, _LANES), out_map),
            pl.BlockSpec((1, _SUBLANES, _LANES), out_map),
        ),
        compiler_params=pltpu.CompilerParams(
            dimension_semantics=("parallel", "arbitrary"),
            vmem_limit_bytes=_VMEM_LIMIT_BYTES,
        ),
    )(tj2, tm2)

    # Tiny epilogue: combine per-core / per-lane partials (a few KiB of f32).
    total_sum = jnp.sum(part_sum)
    g_max = jnp.max(part_max)
    total_se = jnp.sum(part_se * jnp.exp(part_max - g_max))
    lme = g_max + jnp.log(total_se) - math.log(n)     # logmeanexp(T_marginal)
    loss = lme - total_sum / n
    return loss, lme


class DVRLossPallas:
    """Mirrors torch DVRLoss: forward value + exp(logmeanexp) moving average.

    The moving average is kept as a device scalar (no per-call host sync).
    """

    def __init__(self, biased: bool = False, alpha: float = 0.01):
        if not isinstance(biased, bool):
            raise TypeError("Parameter `biased' has to be boolean")
        if not isinstance(alpha, float):
            raise TypeError("Parameter `alpha' has to be float")
        if not 0.0 <= alpha <= 1.0:
            raise ValueError("Parameter `alpha' has to be within the range [0; 1]")
        self.biased = biased
        self.alpha = alpha
        self.moving_average = None  # becomes a device scalar after first call

    def __call__(self, T_joined: jax.Array, T_marginal: jax.Array) -> jax.Array:
        loss, lme = dvr_loss_pallas(T_joined, T_marginal)
        if not self.biased:
            # update_moving_average(exp(logmeanexp(T_marginal))) — on device.
            # TODO(synk): the custom unbiased backward (DVRSecondTerm.backward)
            # is not implemented; only the forward value (identical in both
            # modes) is reproduced here.
            current_average = jnp.exp(lme)
            if self.moving_average is None:
                self.moving_average = current_average
            else:
                self.moving_average = (self.alpha * current_average
                                       + (1.0 - self.alpha) * self.moving_average)
        return loss


def _reference(T_joined, T_marginal):
    tj = T_joined.astype(jnp.float32)
    tm = T_marginal.astype(jnp.float32)
    mean_tj = jnp.mean(tj, axis=0)
    lme = jax.scipy.special.logsumexp(tm, axis=0) - math.log(tm.shape[0])
    return -mean_tj + lme


if __name__ == "__main__":
    key = jax.random.PRNGKey(0)
    k1, k2 = jax.random.split(key)

    # Primary small case (batch of 8 scalar statistics, reduced over dim 0).
    N = 8
    T_joined = jax.random.normal(k1, (N,), dtype=jnp.float32)
    T_marginal = jax.random.normal(k2, (N,), dtype=jnp.float32)

    loss_mod = DVRLossPallas(biased=False, alpha=0.01)
    loss = loss_mod(T_joined, T_marginal)
    loss = jax.block_until_ready(loss)

    ref = _reference(T_joined, T_marginal)
    assert jnp.allclose(loss, ref, atol=1e-4, rtol=1e-4), (loss, ref)
    assert loss_mod.moving_average is not None

    # Extra validations:
    #   (n, dtype, max_block_bytes)
    extra_cases = [
        (9216, jnp.float32, 16 * _LANES * 4),   # zero-copy, 2-core grid, ragged last block + clamped tile
        (5000, jnp.float32, 16 * _LANES * 4),   # minimal-pad path, 2-core multi-tile grid
        (4096, jnp.bfloat16, _MAX_BLOCK_BYTES), # bf16 zero-copy, single tile, 16-row alignment
        (1000, jnp.bfloat16, 16 * _LANES * 2),  # bf16 pad path, in-kernel cast + mask
        (2 ** 21, jnp.float32, _MAX_BLOCK_BYTES),  # large aligned N: zero-copy, 2 cores, 4 MiB tiles
    ]
    for n_extra, dt, mbb in extra_cases:
        ka, kb = jax.random.split(jax.random.PRNGKey(n_extra))
        tj = jax.random.normal(ka, (n_extra,), dtype=dt)
        tm = jax.random.normal(kb, (n_extra,), dtype=dt)
        got, _ = dvr_loss_pallas(tj, tm, max_block_bytes=mbb)
        got = jax.block_until_ready(got)
        want = _reference(tj, tm)
        assert jnp.allclose(got, want, atol=5e-4, rtol=5e-4), (n_extra, dt, got, want)

    print("KERNEL_OK")
</pallas_src>

<mosaic_0001>
module attributes {stable_mosaic.version = 11 : i64} {
  func.func @_dvr_partials_kernel(%arg0: i32, %arg1: i32, %arg2: memref<8x128xf32, #tpu.memory_space<vmem>>, %arg3: memref<8x128xf32, #tpu.memory_space<vmem>>, %arg4: memref<1x8x128xf32, #tpu.memory_space<vmem>>, %arg5: memref<1x8x128xf32, #tpu.memory_space<vmem>>, %arg6: memref<1x8x128xf32, #tpu.memory_space<vmem>>) attributes {dimension_semantics = [#tpu.dimension_semantics<parallel>, #tpu.dimension_semantics<arbitrary>], iteration_bounds = array<i64: 1, 1>, scalar_prefetch = 0 : i64, scratch_operands = 0 : i64, tpu.core_type = #tpu.core_type<tc>, window_params = [{transform_indices = @transform_0, window_bounds = array<i64: 8, 128>}, {transform_indices = @transform_1, window_bounds = array<i64: 8, 128>}, {transform_indices = @transform_2, window_bounds = array<i64: 1, 8, 128>}, {transform_indices = @transform_3, window_bounds = array<i64: 1, 8, 128>}, {transform_indices = @transform_4, window_bounds = array<i64: 1, 8, 128>}]} {
    %c0_i32 = arith.constant 0 : i32
    %0 = arith.cmpi eq, %arg1, %c0_i32 : i32
    %1 = arith.extui %0 : i1 to i32
    %c0_i32_0 = arith.constant 0 : i32
    %2 = arith.cmpi ne, %1, %c0_i32_0 : i32
    scf.if %2 {
      %cst_26 = arith.constant 0.000000e+00 : f32
      %42 = vector.broadcast %cst_26 : f32 to vector<1x8x128xf32>
      %c0_27 = arith.constant 0 : index
      %c0_28 = arith.constant 0 : index
      %c0_29 = arith.constant 0 : index
      %43 = vector.load %arg4[%c0_27, %c0_28, %c0_29] : memref<1x8x128xf32, #tpu.memory_space<vmem>>, vector<1x8x128xf32>
      tpu.vector_store %arg4[%c0_27, %c0_28, %c0_29], %42 {strides = array<i32>} : memref<1x8x128xf32, #tpu.memory_space<vmem>>, vector<1x8x128xf32>,
      %cst_30 = arith.constant -3.40282347E+38 : f32
      %44 = vector.broadcast %cst_30 : f32 to vector<1x8x128xf32>
      %c0_31 = arith.constant 0 : index
      %c0_32 = arith.constant 0 : index
      %c0_33 = arith.constant 0 : index
      %45 = vector.load %arg5[%c0_31, %c0_32, %c0_33] : memref<1x8x128xf32, #tpu.memory_space<vmem>>, vector<1x8x128xf32>
      tpu.vector_store %arg5[%c0_31, %c0_32, %c0_33], %44 {strides = array<i32>} : memref<1x8x128xf32, #tpu.memory_space<vmem>>, vector<1x8x128xf32>,
      %cst_34 = arith.constant 0.000000e+00 : f32
      %46 = vector.broadcast %cst_34 : f32 to vector<1x8x128xf32>
      %c0_35 = arith.constant 0 : index
      %c0_36 = arith.constant 0 : index
      %c0_37 = arith.constant 0 : index
      %47 = vector.load %arg6[%c0_35, %c0_36, %c0_37] : memref<1x8x128xf32, #tpu.memory_space<vmem>>, vector<1x8x128xf32>
      tpu.vector_store %arg6[%c0_35, %c0_36, %c0_37], %46 {strides = array<i32>} : memref<1x8x128xf32, #tpu.memory_space<vmem>>, vector<1x8x128xf32>,
    } else {
    }
    %c0 = arith.constant 0 : index
    %c0_1 = arith.constant 0 : index
    %3 = vector.load %arg2[%c0, %c0_1] : memref<8x128xf32, #tpu.memory_space<vmem>>, vector<8x128xf32>
    %c0_2 = arith.constant 0 : index
    %c0_3 = arith.constant 0 : index
    %4 = vector.load %arg3[%c0_2, %c0_3] : memref<8x128xf32, #tpu.memory_space<vmem>>, vector<8x128xf32>
    %5 = tpu.iota {dimensions = array<i32: 0>} : vector<8x128xi32>
    %6 = tpu.iota {dimensions = array<i32: 1>} : vector<8x128xi32>
    %c128_i32 = arith.constant 128 : i32
    %7 = vector.broadcast %c128_i32 : i32 to vector<8x128xi32>
    %8 = arith.muli %5, %7 : vector<8x128xi32>
    %9 = arith.addi %8, %6 : vector<8x128xi32>
    %c1_i32 = arith.constant 1 : i32
    %10 = arith.muli %arg0, %c1_i32 : i32
    %11 = arith.addi %10, %arg1 : i32
    %c1024_i32 = arith.constant 1024 : i32
    %12 = arith.muli %11, %c1024_i32 : i32
    %c8_i32 = arith.constant 8 : i32
    %13 = arith.subi %c8_i32, %12 : i32
    %14 = vector.broadcast %13 : i32 to vector<8x128xi32>
    %15 = arith.cmpi slt, %9, %14 : vector<8x128xi32>
    %cst = arith.constant 0.000000e+00 : f32
    %16 = vector.broadcast %cst : f32 to vector<8x128xf32>
    %17 = arith.select %15, %3, %16 : vector<8x128xi1>, vector<8x128xf32>
    %cst_4 = arith.constant 0xFF800000 : f32
    %18 = vector.broadcast %cst_4 : f32 to vector<8x128xf32>
    %19 = arith.select %15, %4, %18 : vector<8x128xi1>, vector<8x128xf32>
    %20 = vector.shape_cast %17 : vector<8x128xf32> to vector<1x8x128xf32>
    %21 = vector.shape_cast %19 : vector<8x128xf32> to vector<1x8x128xf32>
    %c0_5 = arith.constant 0 : index
    %c0_6 = arith.constant 0 : index
    %c0_7 = arith.constant 0 : index
    %22 = vector.load %arg4[%c0_5, %c0_6, %c0_7] : memref<1x8x128xf32, #tpu.memory_space<vmem>>, vector<1x8x128xf32>
    %cst_8 = arith.constant dense<0.000000e+00> : vector<8x128xf32>
    %23 = vector.multi_reduction <add>, %20, %cst_8 [0] : vector<1x8x128xf32> to vector<8x128xf32>
    %24 = vector.shape_cast %23 : vector<8x128xf32> to vector<1x8x128xf32>
    %25 = arith.addf %22, %24 : vector<1x8x128xf32>
    %c0_9 = arith.constant 0 : index
    %c0_10 = arith.constant 0 : index
    %c0_11 = arith.constant 0 : index
    %26 = vector.load %arg4[%c0_9, %c0_10, %c0_11] : memref<1x8x128xf32, #tpu.memory_space<vmem>>, vector<1x8x128xf32>
    tpu.vector_store %arg4[%c0_9, %c0_10, %c0_11], %25 {strides = array<i32>} : memref<1x8x128xf32, #tpu.memory_space<vmem>>, vector<1x8x128xf32>,
    %c0_12 = arith.constant 0 : index
    %c0_13 = arith.constant 0 : index
    %c0_14 = arith.constant 0 : index
    %27 = vector.load %arg5[%c0_12, %c0_13, %c0_14] : memref<1x8x128xf32, #tpu.memory_space<vmem>>, vector<1x8x128xf32>
    %cst_15 = arith.constant dense<0xFF800000> : vector<8x128xf32>
    %28 = vector.multi_reduction <maximumf>, %21, %cst_15 [0] : vector<1x8x128xf32> to vector<8x128xf32>
    %29 = vector.shape_cast %28 : vector<8x128xf32> to vector<1x8x128xf32>
    %30 = arith.maximumf %27, %29 : vector<1x8x128xf32>
    %c0_16 = arith.constant 0 : index
    %c0_17 = arith.constant 0 : index
    %c0_18 = arith.constant 0 : index
    %31 = vector.load %arg6[%c0_16, %c0_17, %c0_18] : memref<1x8x128xf32, #tpu.memory_space<vmem>>, vector<1x8x128xf32>
    %32 = arith.subf %27, %30 : vector<1x8x128xf32>
    %33 = math.exp %32 : vector<1x8x128xf32>
    %34 = arith.mulf %31, %33 : vector<1x8x128xf32>
    %35 = arith.subf %21, %30 : vector<1x8x128xf32>
    %36 = math.exp %35 : vector<1x8x128xf32>
    %cst_19 = arith.constant dense<0.000000e+00> : vector<8x128xf32>
    %37 = vector.multi_reduction <add>, %36, %cst_19 [0] : vector<1x8x128xf32> to vector<8x128xf32>
    %38 = vector.shape_cast %37 : vector<8x128xf32> to vector<1x8x128xf32>
    %39 = arith.addf %34, %38 : vector<1x8x128xf32>
    %c0_20 = arith.constant 0 : index
    %c0_21 = arith.constant 0 : index
    %c0_22 = arith.constant 0 : index
    %40 = vector.load %arg6[%c0_20, %c0_21, %c0_22] : memref<1x8x128xf32, #tpu.memory_space<vmem>>, vector<1x8x128xf32>
    tpu.vector_store %arg6[%c0_20, %c0_21, %c0_22], %39 {strides = array<i32>} : memref<1x8x128xf32, #tpu.memory_space<vmem>>, vector<1x8x128xf32>,
    %c0_23 = arith.constant 0 : index
    %c0_24 = arith.constant 0 : index
    %c0_25 = arith.constant 0 : index
    %41 = vector.load %arg5[%c0_23, %c0_24, %c0_25] : memref<1x8x128xf32, #tpu.memory_space<vmem>>, vector<1x8x128xf32>
    tpu.vector_store %arg5[%c0_23, %c0_24, %c0_25], %30 {strides = array<i32>} : memref<1x8x128xf32, #tpu.memory_space<vmem>>, vector<1x8x128xf32>,
    return
  }
  func.func @transform_0(%arg0: i32, %arg1: i32) -> (i32, i32) {
    %c1_i32 = arith.constant 1 : i32
    %0 = arith.muli %arg0, %c1_i32 : i32
    %1 = arith.addi %0, %arg1 : i32
    %c0_i32 = arith.constant 0 : i32
    %2 = arith.minsi %1, %c0_i32 : i32
    %c0_i32_0 = arith.constant 0 : i32
    %c0_i32_1 = arith.constant 0 : i32
    return %2, %c0_i32_0 : i32, i32
  }
  func.func @transform_1(%arg0: i32, %arg1: i32) -> (i32, i32) {
    %c1_i32 = arith.constant 1 : i32
    %0 = arith.muli %arg0, %c1_i32 : i32
    %1 = arith.addi %0, %arg1 : i32
    %c0_i32 = arith.constant 0 : i32
    %2 = arith.minsi %1, %c0_i32 : i32
    %c0_i32_0 = arith.constant 0 : i32
    %c0_i32_1 = arith.constant 0 : i32
    return %2, %c0_i32_0 : i32, i32
  }
  func.func @transform_2(%arg0: i32, %arg1: i32) -> (i32, i32, i32) {
    %c0_i32 = arith.constant 0 : i32
    %c0_i32_0 = arith.constant 0 : i32
    %c0_i32_1 = arith.constant 0 : i32
    return %arg0, %c0_i32, %c0_i32_0 : i32, i32, i32
  }
  func.func @transform_3(%arg0: i32, %arg1: i32) -> (i32, i32, i32) {
    %c0_i32 = arith.constant 0 : i32
    %c0_i32_0 = arith.constant 0 : i32
    %c0_i32_1 = arith.constant 0 : i32
    return %arg0, %c0_i32, %c0_i32_0 : i32, i32, i32
  }
  func.func @transform_4(%arg0: i32, %arg1: i32) -> (i32, i32, i32) {
    %c0_i32 = arith.constant 0 : i32
    %c0_i32_0 = arith.constant 0 : i32
    %c0_i32_1 = arith.constant 0 : i32
    return %arg0, %c0_i32, %c0_i32_0 : i32, i32, i32
  }
}

</mosaic_0001>

<bundles_post_ra>
// kernel: dvr_loss_pallas.1
= control target key start
LH: loop header
LB: loop body
LE: loop exit
PB: predicated region body
PF: predicated region fallthrough
CT: control target
= control target key end

     0   :  { %v77_v0 = vlaneseq  ;;  %s178_s1 = inlined_call_operand.vmem [shape: f32[8,128], index: 1, kind: input, shape index: {}]   ;;  %s179_s0 = inlined_call_operand.vmem [shape: f32[8,128], index: 0, kind: input, shape index: {}]   ;;  %s180_s3 = inlined_call_operand.vmem [shape: f32[1,8,128], index: 3, kind: output, shape index: {1}]   ;;  %s181_s2 = inlined_call_operand.vmem [shape: f32[1,8,128], index: 2, kind: output, shape index: {0}]   ;;  %s182_s4 = inlined_call_operand.vmem [shape: f32[1,8,128], index: 4, kind: output, shape index: {2}]  }
   0x1   :  { %v76_v4 = vld [vmem:[%s178_s1] sm:$0xff] }
   0x2   :  { %v78_v1 = vshrl.u32 %v77_v0, 7  ;;  %v80_v2 = vand.u32 127, %v77_v0  ;;  %v75_v6 = vld [vmem:[%s179_s0] sm:$0xff] }
   0x4   :  { %v81_v3 = vmul.u32 128, %v78_v1 }
   0x6   :  { %v82_v5 = vadd.s32 %v81_v3, %v80_v2 }
   0x8   :  { %vm87_vm0 = vcmp.lt.s32.totalorder %v82_v5, 8 }
   0x9   :  { %v89_v7 = vsel %vm87_vm0, %v76_v4, -inf  ;;  %v88_v8 = vsel %vm87_vm0, %v75_v6, 0.0 }
   0xa   :  { %v95_v9 = vmax.f32 %v89_v7, -3.4028235e+38  ;;  %93 = vst [vmem:[%s181_s2] sm:$0xff] %v88_v8 }
   0xc   :  { %v97_v10 = vsub.f32 -3.4028235e+38, %v95_v9  ;;  %v101_v11 = vsub.f32 %v89_v7, %v95_v9  ;;  %107 = vst [vmem:[%s180_s3] sm:$0xff] %v95_v9 }
   0xe   :  { %v98_v12 = vmul.f32 1.442695, %v97_v10  ;;  %v102_v13 = vmul.f32 1.442695, %v101_v11 }
  0x10   :  { %134 = vpow2.f32 %v98_v12 }
  0x11   :  { %136 = vpow2.f32 %v102_v13 }
  0x1a   :  { %v135_v14 = vpop.eup %134 }
  0x1b   :  { %v137_v15 = vpop.eup %136  ;;  %v100_v16 = vmul.f32 0.0, %v135_v14 }
  0x1d   :  { %v105_v17 = vadd.f32 %v137_v15, %v100_v16 }
  0x1f   :  { %106 = vst [vmem:[%s182_s4] sm:$0xff] %v105_v17 }

</bundles_post_ra>
